<compile_context>
chip_gen: v6e
topology: v6e:2x2x1
jax: 0.10.0
libtpu: 0.0.40
codegen_flags: <defaults>
</compile_context>

<pallas_src>
import jax
import jax.numpy as jnp
from jax.experimental import pallas as pl
from jax.experimental.pallas import tpu as pltpu

_LANES = 128
_SUBLANES = 8


def _logish_kernel(x_ref, o_ref):
    x = x_ref[...]
    # log(1 + sigmoid(x)); log1p is the numerically-stable form.
    o_ref[...] = x * jnp.log1p(jax.nn.sigmoid(x))


def logish_pallas(x, *, block_rows=1024):
    """Elementwise x * log(1 + sigmoid(x)) for any input shape/dtype."""
    orig_shape = x.shape
    orig_dtype = x.dtype
    n = x.size

    xf = x.reshape(-1).astype(jnp.float32)

    # Pad to a whole (8, 128) tile so the 2-D slab is vreg-aligned.
    tile = _SUBLANES * _LANES
    n_pad = pl.cdiv(n, tile) * tile
    if n_pad != n:
        xf = jnp.pad(xf, (0, n_pad - n))
    rows = n_pad // _LANES                      # multiple of 8
    x2d = xf.reshape(rows, _LANES)

    # Pick a block size that divides `rows` exactly and respects the
    # (8, 128) tiling constraint (rows is always a multiple of 8).
    br = min(block_rows, rows)
    while rows % br != 0:
        br //= 2
    grid = (rows // br,)

    out2d = pl.pallas_call(
        _logish_kernel,
        out_shape=jax.ShapeDtypeStruct((rows, _LANES), jnp.float32),
        grid=grid,
        in_specs=[pl.BlockSpec((br, _LANES), lambda i: (i, 0))],
        out_specs=pl.BlockSpec((br, _LANES), lambda i: (i, 0)),
        compiler_params=pltpu.CompilerParams(
            dimension_semantics=("parallel",)),
    )(x2d)

    return out2d.reshape(-1)[:n].reshape(orig_shape).astype(orig_dtype)


def logish_ref(x):
    """Pure-JAX reference of the PyTorch module."""
    xf = x.astype(jnp.float32)
    return (xf * jnp.log1p(jax.nn.sigmoid(xf))).astype(x.dtype)


if __name__ == "__main__":
    # Small shape consistent with an activation module: (batch, channels, H, W).
    key = jax.random.PRNGKey(0)
    x = jax.random.normal(key, (2, 4, 16, 16), jnp.float32)

    out = jax.block_until_ready(logish_pallas(x))
    ref = jax.block_until_ready(logish_ref(x))

    assert out.shape == x.shape
    assert jnp.allclose(out, ref, atol=1e-6, rtol=1e-6), (
        float(jnp.max(jnp.abs(out - ref))))
    print("KERNEL_OK")
</pallas_src>

<mosaic_0001>
module attributes {stable_mosaic.version = 11 : i64} {
  func.func @_logish_kernel(%arg0: i32, %arg1: memref<16x128xf32, #tpu.memory_space<vmem>>, %arg2: memref<16x128xf32, #tpu.memory_space<vmem>>) attributes {dimension_semantics = [#tpu.dimension_semantics<parallel>], iteration_bounds = array<i64: 1>, scalar_prefetch = 0 : i64, scratch_operands = 0 : i64, tpu.core_type = #tpu.core_type<tc>, window_params = [{transform_indices = @transform_0, window_bounds = array<i64: 16, 128>}, {transform_indices = @transform_1, window_bounds = array<i64: 16, 128>}]} {
    %c0 = arith.constant 0 : index
    %c0_0 = arith.constant 0 : index
    %0 = vector.load %arg1[%c0, %c0_0] : memref<16x128xf32, #tpu.memory_space<vmem>>, vector<16x128xf32>
    %1 = arith.negf %0 : vector<16x128xf32>
    %2 = math.exp %1 : vector<16x128xf32>
    %cst = arith.constant 1.000000e+00 : f32
    %3 = vector.broadcast %cst : f32 to vector<16x128xf32>
    %4 = arith.addf %3, %2 : vector<16x128xf32>
    %5 = arith.divf %3, %4 : vector<16x128xf32>
    %6 = math.log1p %5 : vector<16x128xf32>
    %7 = arith.mulf %0, %6 : vector<16x128xf32>
    %c0_1 = arith.constant 0 : index
    %c0_2 = arith.constant 0 : index
    %8 = vector.load %arg2[%c0_1, %c0_2] : memref<16x128xf32, #tpu.memory_space<vmem>>, vector<16x128xf32>
    tpu.vector_store %arg2[%c0_1, %c0_2], %7 {strides = array<i32>} : memref<16x128xf32, #tpu.memory_space<vmem>>, vector<16x128xf32>,
    return
  }
  func.func @transform_0(%arg0: i32) -> (i32, i32) {
    %c0_i32 = arith.constant 0 : i32
    %c0_i32_0 = arith.constant 0 : i32
    return %arg0, %c0_i32 : i32, i32
  }
  func.func @transform_1(%arg0: i32) -> (i32, i32) {
    %c0_i32 = arith.constant 0 : i32
    %c0_i32_0 = arith.constant 0 : i32
    return %arg0, %c0_i32 : i32, i32
  }
}

</mosaic_0001>

<bundles_post_ra>
// kernel: tpu_custom_call.1
= control target key start
LH: loop header
LB: loop body
LE: loop exit
PB: predicated region body
PF: predicated region fallthrough
CT: control target
= control target key end

     0   :  { %6 = vsyncpa [#allocation3], 0  ;;  %s164_s0 = inlined_call_operand.hbm [shape: f32[16,128], index: 0, kind: input, shape index: {}]   ;;  %s165_s1 = inlined_call_operand.hbm [shape: f32[16,128], index: 1, kind: output, shape index: {}]  }
   0x1   :  { %7 = vsyncpa [#allocation4], 0  ;;  %s138_s6 = smov [#allocation2]  }
   0x2   :  { %s13_s7 = sshll.u32 %s138_s6, 4  ;;  %s14_s7 = int_to_ptr.vmem [resolvable:$true] %s13_s7 }
   0x3   :  { %s102_s8 = scalar_lea.vmem %s14_s7, 256  ;;  %p107_p1 = scmp.lt.s32.totalorder %s14_s7, %s14_s7 }
   0x4   :  { %p103_p0 = scmp.ne.s32.totalorder %s14_s7, %s102_s8  ;;  %p108_p2 = scmp.lt.s32.totalorder %s102_s8, %s102_s8 }
   0x6   :  { %p109_p3 = por %p108_p2, %p107_p1 }
   0x8   :  { %p110_p4 = pnand %p109_p3, %p103_p0 }
   0xa   :  { %113 = shalt.err (!%p110_p4)
}
   0xb   :  { %s139_s9 = smov 128   ;;  %s140_s10 = smov 8  }
   0xc   :  { %19 = dma.hbm_to_vmem [thread:$0]  %s164_s0, 256, %s14_s7, [#allocation3], %s139_s9, %s139_s9, %s140_s10  }
   0xd   :  { %134 = dma.done.wait [#allocation3], 256  }
   0xe   :  { %135 = vsyncadd [#allocation3], 4294967040  ;;  %v23_v0 = vld [vmem:[#allocation2] sm:$0xff]  ;;  %v24_v1 = vld [vmem:[#allocation2 + $0x8] sm:$0xff]  ;;  %s141_s0 = smov [#allocation5]  }
   0xf   :  { %v76_v2 = vmul.f32 -1.442695, %v23_v0  ;;  %v77_v3 = vmul.f32 -1.442695, %v24_v1  ;;  %s64_s13 = sshll.u32 %s141_s0, 4  ;;  %s65_s13 = int_to_ptr.vmem [resolvable:$true] %s64_s13 }
  0x10   :  { %s114_s14 = scalar_lea.vmem %s65_s13, 256  ;;  %p119_p6 = scmp.lt.s32.totalorder %s65_s13, %s65_s13 }
  0x11   :  { %82 = vpow2.f32 %v76_v2  ;;  %p115_p5 = scmp.ne.s32.totalorder %s65_s13, %s114_s14  ;;  %p120_p7 = scmp.lt.s32.totalorder %s114_s14, %s114_s14 }
  0x12   :  { %84 = vpow2.f32 %v77_v3 }
  0x13   :  { %p121_p8 = por %p120_p7, %p119_p6 }
  0x15   :  { %p122_p9 = pnand %p121_p8, %p115_p5 }
  0x1e   :  { %v83_v4 = vpop.eup %82 }
  0x1f   :  { %v85_v5 = vpop.eup %84  ;;  %v31_v6 = vadd.f32 1.0, %v83_v4 }
  0x20   :  { %v32_v7 = vadd.f32 1.0, %v85_v5 }
  0x21   :  { %86 = vrcp.f32 %v31_v6 }
  0x22   :  { %88 = vrcp.f32 %v32_v7 }
  0x2e   :  { %v87_v8 = vpop.eup %86 }
  0x2f   :  { %v89_v9 = vpop.eup %88  ;;  %v37_v10 = vadd.f32 1.0, %v87_v8  ;;  %v40_v12 = vmul.f32 -0.5, %v87_v8  ;;  %v43_v15 = vand.u32 2147483647, %v87_v8 }
  0x30   :  { %v46_v11 = vadd.f32 1.0, %v89_v9  ;;  %v49_v13 = vmul.f32 -0.5, %v89_v9  ;;  %v52_v17 = vand.u32 2147483647, %v89_v9 }
  0x31   :  { %90 = vlog2.f32 %v37_v10  ;;  %v41_v14 = vadd.f32 1.0, %v40_v12  ;;  %vm44_vm0 = vcmp.lt.f32.partialorder %v43_v15, 0.0004427343 }
  0x32   :  { %92 = vlog2.f32 %v46_v11  ;;  %v50_v16 = vadd.f32 1.0, %v49_v13  ;;  %vm53_vm1 = vcmp.lt.f32.partialorder %v52_v17, 0.0004427343 }
  0x33   :  { %v42_v18 = vmul.f32 %v87_v8, %v41_v14 }
  0x34   :  { %v51_v20 = vmul.f32 %v89_v9, %v50_v16 }
  0x3e   :  { %v91_v19 = vpop.eup %90 }
  0x3f   :  { %v93_v21 = vpop.eup %92  ;;  %v39_v22 = vmul.f32 0.6931472, %v91_v19 }
  0x40   :  { %v48_v23 = vmul.f32 0.6931472, %v93_v21 }
  0x41   :  { %v45_v24 = vsel %vm44_vm0, %v42_v18, %v39_v22 }
  0x42   :  { %v55_v25 = vmul.f32 %v45_v24, %v23_v0  ;;  %v54_v26 = vsel %vm53_vm1, %v51_v20, %v48_v23 }
  0x43   :  { %v56_v27 = vmul.f32 %v54_v26, %v24_v1 }
  0x44   :  { %57 = vst [vmem:[#allocation5] sm:$0xff] %v55_v25 }
  0x45   :  { %58 = vst [vmem:[#allocation5 + $0x8] sm:$0xff] %v56_v27 }
  0x46   :  { %125 = shalt.err (!%p122_p9)
}
  0x47   :  { %70 = dma.vmem_to_hbm [thread:$0]  %s65_s13, 256, %s165_s1, [#allocation4], %s139_s9, %s139_s9, %s140_s10  }
  0x48   :  { %136 = dma.done.wait [#allocation4], 256  }
  0x49   :  { %137 = vsyncadd [#allocation4], 4294967040 }
  0x4a   :  { %74 = vsyncpa [#allocation3], 1 }
  0x4b   :  { %75 = vsyncpa [#allocation4], 1 }

</bundles_post_ra>
